<compile_context>
chip_gen: v7x
topology: tpu7x:2x2x1
jax: 0.10.0
libtpu: 0.0.40
codegen_flags: <defaults>
</compile_context>

<pallas_src>
import jax
import jax.numpy as jnp
from jax import lax
from jax.experimental import pallas as pl
from jax.experimental.pallas import tpu as pltpu


# ----------------------------------------------------------------------------
# Encoder head: AdaptiveAvgPool2d((s, s)) + permute(0, 2, 3, 1)
# ----------------------------------------------------------------------------
def encoder_pool_forward(feature_map, enc_img_size=14):
    """feature_map: (B, C, H, W) backbone activations -> (B, s, s, C)."""
    B, C, H, W = feature_map.shape
    s = enc_img_size
    # TODO(synk): general AdaptiveAvgPool2d bins (H % s != 0) not implemented;
    # integer-ratio pooling only.
    assert H % s == 0 and W % s == 0, "spatial dims must be divisible by enc_img_size"
    rh, rw = H // s, W // s
    inv_area = 1.0 / float(rh * rw)

    # The module's permute(0,2,3,1) applied up front (commutes with pooling):
    # channels become the lane axis inside the kernel.
    x = jnp.transpose(feature_map, (0, 2, 3, 1))                # (B, H, W, C)

    # (s, W) pooling matrix for the W direction (H direction is handled by the
    # grid blocking: each grid step sees exactly the rh rows of one output row).
    pool_w = (jnp.arange(W)[None, :] // rw ==
              jnp.arange(s)[:, None]).astype(jnp.float32)       # (s, W)

    def kernel(x_ref, pw_ref, o_ref):
        xs = x_ref[0].astype(jnp.float32)                       # (rh, W, C)
        colsum = jnp.sum(xs, axis=0)                            # (W, C): pool along H
        pooled = jnp.dot(pw_ref[...], colsum,
                         preferred_element_type=jnp.float32)    # (s, C): pool along W
        o_ref[0, 0] = (pooled * inv_area).astype(o_ref.dtype)

    return pl.pallas_call(
        kernel,
        grid=(B, s),
        in_specs=[
            pl.BlockSpec((1, rh, W, C), lambda b, i: (b, i, 0, 0)),
            pl.BlockSpec((s, W), lambda b, i: (0, 0)),
        ],
        out_specs=pl.BlockSpec((1, 1, s, C), lambda b, i: (b, i, 0, 0)),
        out_shape=jax.ShapeDtypeStruct((B, s, s, C), feature_map.dtype),
        compiler_params=pltpu.CompilerParams(
            dimension_semantics=("parallel", "parallel")),
    )(x, pool_w)


# ----------------------------------------------------------------------------
# Attention head
# ----------------------------------------------------------------------------
def _vmem_capacity_bytes():
    try:
        info = pltpu.get_tpu_info()
        cap = getattr(info, "vmem_capacity_bytes", None)
        if cap:
            return int(cap)
    except Exception:
        pass
    return 64 * 1024 * 1024  # conservative fallback (v7x-sized)


def _pick_batch_tile(B, Pp, E, A, budget_bytes, feat_buffers=2):
    """Largest sublane-aligned batch tile that fits the VMEM budget while
    keeping >= 2 (ideally 4) grid steps for v7x megacore + pipelining."""
    per_sample = (
        feat_buffers * Pp * E * 4     # pipelined f32 feature tiles
        + Pp * E * 2                  # in-kernel bf16 cast of the tile
        + Pp * E * 4                  # alpha * feat product (f32)
        + 3 * Pp * A * 4              # att1 / relu(z) / z*wa f32 temporaries
        + 2 * A * 4                   # double-buffered att2 tile
        + 2 * (E + Pp) * 4            # double-buffered outputs
        + 4 * Pp * 4                  # att / e / alpha / iota row temporaries
    )
    cap = max(1, budget_bytes // max(per_sample, 1))
    best = None
    for d in range(1, B + 1):
        if B % d or d > cap:
            continue
        steps = B // d
        # prefer sublane-aligned tiles (mult of 8, or the whole batch), then
        # >=2 steps, then >=4 steps, then an even step count, then bigger tiles
        aligned = (d % 8 == 0) or (d == B)
        key = (aligned, steps >= 2, steps >= 4, steps % 2 == 0, d)
        if best is None or key > best[0]:
            best = (key, d)
    return best[1] if best else 1


def prepare_attention_params(params):
    """One-time re-layout/cast of the attention weights (hoist out of the
    per-decode-step call)."""
    W_enc, b_enc, W_dec, b_dec, W_att, b_att = params
    A, E = W_enc.shape
    return {
        "WencT": W_enc.T.astype(jnp.bfloat16),            # (E, A) resident MXU operand
        "b_enc": b_enc.reshape(1, A).astype(jnp.float32),
        "WdecT": W_dec.T.astype(jnp.float32),             # (L, A) for the XLA pre-matmul
        "b_dec": b_dec.reshape(1, A).astype(jnp.float32),
        "wa_row": W_att.reshape(1, A).astype(jnp.float32),
        "b_att": b_att.reshape(1, 1).astype(jnp.float32),
    }


def attention_forward(features, hidden_state, prepared, *,
                      batch_tile=None, approx_reciprocal=True,
                      feature_buffer_count=2, pixel_align=8):
    """features: (B, P, E) f32; hidden_state: (B, L) f32.

    approx_reciprocal: use the EUP approximate reciprocal for the softmax
    denominator (rows sum to ~1, not exactly 1); set False for exact division.
    feature_buffer_count: >2 enables deeper pipelining of the features stream
    (useful on v5e where the feature DMA latency can be exposed).
    """
    B, P, E = features.shape
    WencT, b_enc = prepared["WencT"], prepared["b_enc"]
    WdecT, b_dec = prepared["WdecT"], prepared["b_dec"]
    wa_row, b_att = prepared["wa_row"], prepared["b_att"]
    A = WencT.shape[1]
    L = WdecT.shape[0]
    assert WencT.shape[0] == E and hidden_state.shape == (B, L)
    assert E % 128 == 0 and A % 128 == 0, \
        "encoder_dim / attention_dim must be multiples of 128 (lane axis)"

    # decoder_fc for the whole batch: one well-utilized XLA matmul, f32.
    att2 = hidden_state.astype(jnp.float32) @ WdecT + b_dec          # (B, A)

    # Pad pixels to a sublane-aligned count (ResNet P = 196 -> 200); padded
    # pixels are masked out of the softmax inside the kernel.
    Pp = ((P + pixel_align - 1) // pixel_align) * pixel_align
    feat = features if Pp == P else jnp.pad(features, ((0, 0), (0, Pp - P), (0, 0)))

    # Generation-aware VMEM budgeting: 64 MiB on v7x, 128 MiB on v5e/v6e.
    cap = _vmem_capacity_bytes()
    vmem_limit = int(0.6 * cap)                    # ~38 MiB v7x, ~77 MiB v5e/v6e
    tile_budget = int(0.4 * cap) - 4 * E * A       # minus resident bf16 weights

    n_buf = max(2, int(feature_buffer_count))
    tb = batch_tile or _pick_batch_tile(B, Pp, E, A, tile_budget, feat_buffers=n_buf)
    tb = max(1, min(tb, B))
    while B % tb:
        tb -= 1

    def kernel(feat_ref, att2_ref, we_ref, be_ref, wa_ref, ba_ref,
               awe_ref, alpha_ref):
        TB = feat_ref.shape[0]
        feat_f32 = feat_ref[...]                             # (TB, Pp, E) f32
        feat_bf = feat_f32.astype(jnp.bfloat16)              # in-kernel MXU feed cast

        # encoder_fc as ONE flattened (TB*Pp, E) @ (E, A) MXU pass, f32 accumulate.
        att1 = jnp.dot(feat_bf.reshape(TB * Pp, E), we_ref[...],
                       preferred_element_type=jnp.float32)
        att1 = att1.reshape(TB, Pp, A) + be_ref[...]

        # relu(att1 + att2); att_fc (out_features=1) as VPU multiply + lane reduce.
        z = jnp.maximum(att1 + att2_ref[...][:, None, :], 0.0)
        att = jnp.sum(z * wa_ref[...], axis=-1) + ba_ref[0, 0]        # (TB, Pp)

        if Pp != P:  # mask padded pixels out of the softmax (static branch)
            pix = lax.broadcasted_iota(jnp.int32, (TB, Pp), 1)
            att = jnp.where(pix < P, att, -jnp.inf)

        m = jnp.max(att, axis=-1, keepdims=True)
        e = jnp.exp(att - m)
        den = jnp.sum(e, axis=-1, keepdims=True)
        if approx_reciprocal:
            alpha = e * pl.reciprocal(den, approx=True)
        else:
            alpha = e / den

        alpha_ref[...] = alpha.astype(alpha_ref.dtype)
        # attention_weighted_encoding on the VPU (sublane reduce over pixels):
        # padded alpha entries are exactly 0, so padding does not contribute.
        awe_ref[...] = jnp.sum(alpha[:, :, None] * feat_f32, axis=1).astype(awe_ref.dtype)

    if n_buf > 2:
        feat_spec = pl.BlockSpec((tb, Pp, E), lambda b: (b, 0, 0),
                                 pipeline_mode=pl.Buffered(n_buf))
    else:
        feat_spec = pl.BlockSpec((tb, Pp, E), lambda b: (b, 0, 0))

    awe, alpha_full = pl.pallas_call(
        kernel,
        grid=(B // tb,),
        in_specs=[
            feat_spec,                                               # features tile (f32)
            pl.BlockSpec((tb, A), lambda b: (b, 0)),                 # precomputed att2 tile
            pl.BlockSpec((E, A), lambda b: (0, 0)),                  # encoder_fc weight (bf16)
            pl.BlockSpec((1, A), lambda b: (0, 0)),                  # encoder_fc bias
            pl.BlockSpec((1, A), lambda b: (0, 0)),                  # att_fc weight row
            pl.BlockSpec(memory_space=pltpu.MemorySpace.SMEM),       # att_fc scalar bias
        ],
        out_specs=(
            pl.BlockSpec((tb, E), lambda b: (b, 0)),                 # awe tile
            pl.BlockSpec((tb, Pp), lambda b: (b, 0)),                # alpha tile
        ),
        out_shape=(jax.ShapeDtypeStruct((B, E), jnp.float32),
                   jax.ShapeDtypeStruct((B, Pp), jnp.float32)),
        compiler_params=pltpu.CompilerParams(
            dimension_semantics=("parallel",),
            vmem_limit_bytes=vmem_limit),
    )(feat, att2, WencT, b_enc, wa_row, b_att)

    return awe, alpha_full[:, :P]


# ----------------------------------------------------------------------------
# Parameters and pure-JAX references
# ----------------------------------------------------------------------------
def init_params(key, encoder_dim, lstm_size, attention_dim):
    k1, k2, k3, k4, k5, k6 = jax.random.split(key, 6)
    # PyTorch nn.Linear weight shape: (out_features, in_features)
    W_enc = jax.random.normal(k1, (attention_dim, encoder_dim), jnp.float32) * 0.1
    b_enc = jax.random.normal(k2, (attention_dim,), jnp.float32) * 0.1
    W_dec = jax.random.normal(k3, (attention_dim, lstm_size), jnp.float32) * 0.1
    b_dec = jax.random.normal(k4, (attention_dim,), jnp.float32) * 0.1
    W_att = jax.random.normal(k5, (1, attention_dim), jnp.float32) * 0.1
    b_att = jax.random.normal(k6, (1,), jnp.float32) * 0.1
    return (W_enc, b_enc, W_dec, b_dec, W_att, b_att)


def reference_forward(features, hidden_state, params):
    """Pure-JAX f32 reference mirroring the PyTorch attention forward."""
    W_enc, b_enc, W_dec, b_dec, W_att, b_att = params
    att1 = features @ W_enc.T + b_enc                        # (B, P, A)
    att2 = hidden_state @ W_dec.T + b_dec                    # (B, A)
    z = jnp.maximum(att1 + att2[:, None, :], 0.0)
    att = (z @ W_att.T)[:, :, 0] + b_att[0]                  # (B, P)
    alpha = jax.nn.softmax(att, axis=1)
    awe = jnp.sum(alpha[:, :, None] * features, axis=1)
    return awe, alpha


def reference_forward_mixed(features, hidden_state, params):
    """Reference mirroring the kernel's precision (bf16 MXU for encoder_fc with
    f32 accumulation, f32 everywhere else)."""
    W_enc, b_enc, W_dec, b_dec, W_att, b_att = params
    featb = features.astype(jnp.bfloat16)
    att1 = jnp.einsum('bpe,ea->bpa', featb, W_enc.T.astype(jnp.bfloat16),
                      preferred_element_type=jnp.float32) + b_enc
    att2 = hidden_state @ W_dec.T + b_dec
    z = jnp.maximum(att1 + att2[:, None, :], 0.0)
    att = jnp.sum(z * W_att.reshape(1, 1, -1), axis=-1) + b_att[0]
    alpha = jax.nn.softmax(att, axis=-1)
    awe = jnp.sum(alpha[:, :, None] * features, axis=1)
    return awe, alpha


if __name__ == "__main__":
    # Small shapes consistent with the module: enc_img_size=14 -> P = 196 pixels
    # (deliberately not 8/128-aligned to exercise the softmax mask).
    B = 32
    C = E = 256          # encoder channels (small stand-in for ResNet-101's 2048)
    H = W = 28           # backbone feature-map spatial size
    S = 14               # enc_img_size
    L = 128              # decoder LSTM size
    A = 128              # attention_dim

    key = jax.random.PRNGKey(0)
    kf, kh, kp = jax.random.split(key, 3)
    fmap = jax.random.normal(kf, (B, C, H, W), jnp.float32)
    hidden_state = jax.random.normal(kh, (B, L), jnp.float32)
    params = init_params(kp, E, L, A)

    # --- Encoder head: adaptive average pool + channels-last permute ---------
    enc = encoder_pool_forward(fmap, enc_img_size=S)          # (B, S, S, C)
    jax.block_until_ready(enc)
    enc_ref = jnp.transpose(
        fmap.reshape(B, C, S, H // S, S, W // S).mean(axis=(3, 5)), (0, 2, 3, 1))
    assert jnp.allclose(enc, enc_ref, atol=1e-5, rtol=1e-5)

    # --- Attention over the flattened encoder features -----------------------
    features = enc.reshape(B, S * S, C)                       # (B, 196, 256)
    prepared = prepare_attention_params(params)               # hoisted, once
    awe, alpha = attention_forward(features, hidden_state, prepared)
    jax.block_until_ready((awe, alpha))

    # Tight check against a precision-matched reference.
    awe_m, alpha_m = reference_forward_mixed(features, hidden_state, params)
    assert jnp.allclose(alpha, alpha_m, atol=5e-3, rtol=5e-3)
    assert jnp.allclose(awe, awe_m, atol=5e-3, rtol=5e-3)

    # Looser sanity check against the pure-f32 PyTorch-equivalent math.
    awe_f, alpha_f = reference_forward(features, hidden_state, params)
    assert jnp.allclose(alpha, alpha_f, atol=1e-1, rtol=1e-1)
    assert jnp.allclose(awe, awe_f, atol=1e-1, rtol=1e-1)

    print("KERNEL_OK")
</pallas_src>

<mosaic_0001>
module attributes {stable_mosaic.version = 11 : i64} {
  func.func @kernel(%arg0: i32, %arg1: i32, %arg2: memref<1x2x28x256xf32, #tpu.memory_space<vmem>>, %arg3: memref<14x28xf32, #tpu.memory_space<vmem>>, %arg4: memref<1x1x14x256xf32, #tpu.memory_space<vmem>>) attributes {dimension_semantics = [#tpu.dimension_semantics<parallel>, #tpu.dimension_semantics<parallel>], iteration_bounds = array<i64: 32, 14>, scalar_prefetch = 0 : i64, scratch_operands = 0 : i64, tpu.core_type = #tpu.core_type<tc>, window_params = [{transform_indices = @transform_0, window_bounds = array<i64: 1, 2, 28, 256>}, {pipeline_mode = #tpu.pipeline_mode<synchronous>, transform_indices = @transform_1, window_bounds = array<i64: 14, 28>}, {transform_indices = @transform_2, window_bounds = array<i64: 1, 1, 14, 256>}]} {
    %c0 = arith.constant 0 : index
    %c0_0 = arith.constant 0 : index
    %c0_1 = arith.constant 0 : index
    %c0_2 = arith.constant 0 : index
    %0 = vector.load %arg2[%c0, %c0_0, %c0_1, %c0_2] : memref<1x2x28x256xf32, #tpu.memory_space<vmem>>, vector<1x2x28x256xf32>
    %1 = vector.shape_cast %0 : vector<1x2x28x256xf32> to vector<2x28x256xf32>
    %cst = arith.constant dense<0.000000e+00> : vector<28x256xf32>
    %2 = vector.multi_reduction <add>, %1, %cst [0] : vector<2x28x256xf32> to vector<28x256xf32>
    %c0_3 = arith.constant 0 : index
    %c0_4 = arith.constant 0 : index
    %3 = vector.load %arg3[%c0_3, %c0_4] : memref<14x28xf32, #tpu.memory_space<vmem>>, vector<14x28xf32>
    %cst_5 = arith.constant dense<0.000000e+00> : vector<14x256xf32>
    %4 = tpu.matmul %3, %2, %cst_5 {dimension_numbers = #tpu.dot_dimension_numbers<[1], [0], [0], [1], [0, 0, 1, 1], [], []>} : vector<14x28xf32>, vector<28x256xf32>, vector<14x256xf32> -> vector<14x256xf32>
    %cst_6 = arith.constant 2.500000e-01 : f32
    %5 = vector.broadcast %cst_6 : f32 to vector<14x256xf32>
    %6 = arith.mulf %4, %5 : vector<14x256xf32>
    %c0_7 = arith.constant 0 : index
    %c0_8 = arith.constant 0 : index
    %c0_9 = arith.constant 0 : index
    %c0_10 = arith.constant 0 : index
    %7 = vector.load %arg4[%c0_7, %c0_8, %c0_9, %c0_10] : memref<1x1x14x256xf32, #tpu.memory_space<vmem>>, vector<1x1x14x256xf32>
    %8 = vector.shape_cast %7 : vector<1x1x14x256xf32> to vector<14x256xf32>
    %9 = vector.shape_cast %6 : vector<14x256xf32> to vector<1x1x14x256xf32>
    tpu.vector_store %arg4[%c0_7, %c0_8, %c0_9, %c0_10], %9 {strides = array<i32>} : memref<1x1x14x256xf32, #tpu.memory_space<vmem>>, vector<1x1x14x256xf32>,
    return
  }
  func.func @transform_0(%arg0: i32, %arg1: i32) -> (i32, i32, i32, i32) {
    %c0_i32 = arith.constant 0 : i32
    %c0_i32_0 = arith.constant 0 : i32
    %c0_i32_1 = arith.constant 0 : i32
    return %arg0, %arg1, %c0_i32, %c0_i32_0 : i32, i32, i32, i32
  }
  func.func @transform_1(%arg0: i32, %arg1: i32) -> (i32, i32) {
    %c0_i32 = arith.constant 0 : i32
    %c0_i32_0 = arith.constant 0 : i32
    %c0_i32_1 = arith.constant 0 : i32
    return %c0_i32, %c0_i32_0 : i32, i32
  }
  func.func @transform_2(%arg0: i32, %arg1: i32) -> (i32, i32, i32, i32) {
    %c0_i32 = arith.constant 0 : i32
    %c0_i32_0 = arith.constant 0 : i32
    %c0_i32_1 = arith.constant 0 : i32
    return %arg0, %arg1, %c0_i32, %c0_i32_0 : i32, i32, i32, i32
  }
}

</mosaic_0001>

<bundles_post_ra>
// kernel: tpu_custom_call.1
= control target key start
LH: loop header
LB: loop body
LE: loop exit
PB: predicated region body
PF: predicated region fallthrough
CT: control target
= control target key end

     0   :  { %7 = vsyncpa [#allocation3], 0  ;;  %s780_s0 = inlined_call_operand.vmem [shape: f32[32,28,28,256], index: 0, kind: input, shape index: {}]   ;;  %s781_s1 = inlined_call_operand.vmem [shape: f32[14,28], index: 1, kind: input, shape index: {}]   ;;  %s782_s2 = inlined_call_operand.hbm [shape: f32[32,14,14,256], index: 2, kind: output, shape index: {}]  }
   0x1   :  { %9 = vsyncpa [#allocation3 + $0x1], 0  ;;  %s630_s9 = smov 0   ;;  %s632_s10 = smov 0  }
   0x2   :  { %s634_s11 = smov 0   ;;  %s636_s12 = smov 0  }
   0x3   :  { %s638_s13 = smov 0   ;;  %s640_s14 = smov 0  }
   0x4   :  { %s642_s15 = smov 0   ;;  %s644_s16 = smov 0  }
   0x5 LB: > { %s405_s17 = sadd.s32 4294967295, %s608_s16   ;;  %s406_s18 = sadd.s32 4294967294, %s608_s16   ;;  %s608_s16 = sphi %s644_s16, %s15_s16   ;;  %s604_s15 = sphi %s642_s15, %s791_s15   ;;  %s600_s14 = sphi %s640_s14, %s790_s14   ;;  %s596_s13 = sphi %s638_s13, %s789_s13   ;;  %s592_s12 = sphi %s636_s12, %s788_s12   ;;  %s588_s11 = sphi %s634_s11, %s787_s11   ;;  %s584_s10 = sphi %s632_s10, %s786_s10   ;;  %s580_s9 = sphi %s630_s9, %s785_s9  }
   0x6   : > { %s24_s19 = sadd.s32 1, %s600_s14  ;;  %s27_s20 = sadd.s32 1, %s604_s15 }
   0x7   : > { %p25_p0 = scmp.ge.s32.totalorder %s24_s19, 14  ;;  %p95_p1 = scmp.ne.s32.totalorder %s588_s11, %s584_s10 }
   0x8   : > { %p96_p2 = scmp.eq.s32.totalorder %s405_s17, 447  ;;  %p101_p5 = scmp.ne.s32.totalorder %s584_s10, %s580_s9 }
   0x9   : > { %s793_s19 = smov (%p25_p0, %s24_s19), 0  ;;  %s795_s20 = smov (!%p25_p0, %s27_s20), %s604_s15 }
   0xa   : > { %s81_s21 = ssub.s32 %s600_s14, %s793_s19  ;;  %p681_p3 = por %p96_p2, %p95_p1 }
   0xb   : > { %p29_p4 = scmp.ge.s32.totalorder %s795_s20, 32  ;;  %p102_p6 = scmp.eq.s32.totalorder %s406_s18, 447 }
   0xc   : > { %p409_p7 = scmp.ge.s32.totalorder %s608_s16, 1  ;;  %p137_p9 = scmp.lt.s32.totalorder %s608_s16, 449 }
   0xd   : > { %s797_s20 = smov (%p29_p4, %s795_s20), 0  ;;  %p690_p8 = por %p102_p6, %p101_p5 }
   0xe   : > { %s80_s24 = ssub.s32 %s604_s15, %s797_s20  ;;  %s85_s25 = sadd.s32 1, %s588_s11 }
   0xf   : > { %s82_s26 = sor.u32 %s81_s21, %s80_s24  ;;  %p138_p10 = pnand %p409_p7, %p137_p9 }
  0x10   : > { %p83_p11 = scmp.eq.s32.totalorder %s82_s26, 0  ;;  %s411_s28 = sshll.u32 (!%p138_p10), %s592_s12, 1  ;;  %v610_v0 = vmov (!%p138_p10), 0.0   ;;  %vm197_vm0 = vcmask (!%p138_p10), 1043456   ;;  %vm611_vm1 = vmmov (!%p138_p10), 1   ;;  %v204_v33 = vld [vmem:[%s781_s1] sm:$0xff] (!%p138_p10) }
  0x11   : > { %141 = sbr.rel (%p138_p10) target bundleno = 275 (0x113), region = 28  ;;  %p165_p12 = scmp.lt.s32.totalorder (!%p138_p10), %s596_s13, 31  ;;  %283 = vmatprep.mubr.f32.mxu0 (!%p138_p10), %v610_v0  ;;  %289 = vmatprep.mubr.f32.mxu1 (!%p138_p10), %v610_v0  ;;  %vm428_vm2 = vmpackc.low (!%p138_p10), %vm197_vm0, %vm611_vm1  ;;  %vm206_vm3 = vcmask (!%p138_p10), 228352   ;;  %v205_v34 = vld [vmem:[%s781_s1 + $0x8] sm:$0x3f] (!%p138_p10) }
  0x12   : > { %s699_s27 = scalar_select %p83_p11, %s588_s11, %s85_s25  }
  0x13   : > { %p167_p13 = scmp.lt.s32.totalorder (!%p138_p10), %s411_s28, 27  ;;  %s161_s25 = sand.u32 (!%p138_p10), 1, %s584_s10  }
  0x14   : > { %s438_s26 = smul.u32 (!%p138_p10), 56, %s596_s13  ;;  %s612_s17 = smov (!%p138_p10), [#allocation2]  }
  0x15   : > { %s518_s18 = sshll.u32 (!%p138_p10), %s612_s17, 4  ;;  %s519_s18 = int_to_ptr.vmem [resolvable:$false] %s518_s18 }
  0x16   : > { %s520_s21 = scalar_lea.vmem (!%p138_p10), %s519_s18, 1024 }
  0x18   : > { %s166_s29 = scalar_select %p165_p12, %s596_s13, 31 }
  0x19   : > { %s799_s28 = smov (!%p167_p13, %s411_s28), 27 }
  0x1a   : > { %s437_s30 = smul.u32 224, %s166_s29  ;;  %s412_s3 = sshll.u32 %s799_s28, 3 }
  0x1b   : > { %s410_s28 = sshll.u32 %s161_s25, 5  ;;  %s419_s29 = sshll.u32 %s592_s12, 2 }
  0x1c   : > { %s171_s4 = sadd.s32 %s437_s30, %s412_s3  ;;  %s317_s30 = sadd.s32 %s438_s26, %s419_s29 }
  0x1d   : > { %s413_s5 = sshll.u32 %s171_s4, 3  ;;  %s163_s3 = scalar_lea.vmem [#allocation2], %s410_s28 }
  0x1e   : > { %s173_s8 = scalar_lea.vmem %s780_s0, %s413_s5  ;;  %s320_s4 = sshll.u32 %s163_s3, 4  ;;  %s721_s4 = int_to_ptr.vmem [resolvable:$true] %s320_s4 }
  0x1f   : > { %v176_v1 = vld [vmem:[%s173_s8 + $0x8] sm:$0xff]  ;;  %v178_v2 = vld [vmem:[%s173_s8 + $0x18] sm:$0xff]  ;;  %v175_v6 = vld [vmem:[%s173_s8] sm:$0xff]  ;;  %s420_s5 = sshll.u32 %s317_s30, 7  ;;  %s728_s12 = scalar_lea.sflag [#allocation3], %s161_s25 }
  0x20   : > { %v184_v3 = vld [vmem:[%s173_s8 + $0x48] sm:$0xff]  ;;  %v186_v4 = vld [vmem:[%s173_s8 + $0x58] sm:$0xff]  ;;  %v177_v7 = vld [vmem:[%s173_s8 + $0x10] sm:$0xff]  ;;  %s726_s13 = scalar_lea.hbm %s782_s2, %s420_s5  ;;  %p521_p4 = scmp.lt.s32.totalorder %s721_s4, %s519_s18 }
  0x21   : > { %v192_v5 = vadd.f32 %v184_v3, %v176_v1  ;;  %v194_v8 = vadd.f32 %v186_v4, %v178_v2  ;;  %v183_v9 = vld [vmem:[%s173_s8 + $0x40] sm:$0xff]  ;;  %v185_v10 = vld [vmem:[%s173_s8 + $0x50] sm:$0xff]  ;;  %v180_v11 = vld [vmem:[%s173_s8 + $0x28] sm:$0xff] }
  0x22   : > { %v191_v12 = vadd.f32 %v183_v9, %v175_v6  ;;  %v193_v13 = vadd.f32 %v185_v10, %v177_v7  ;;  %v182_v14 = vld [vmem:[%s173_s8 + $0x38] sm:$0xf]  ;;  %v188_v15 = vld [vmem:[%s173_s8 + $0x68] sm:$0xff]  ;;  %v179_v21 = vld [vmem:[%s173_s8 + $0x20] sm:$0xff] }
  0x23   : > { %v190_v16 = vld [vmem:[%s173_s8 + $0x78] sm:$0xf]  ;;  %v423_v17 = vpack.c.bf16 %v194_v8, %v192_v5  ;;  %v196_v18 = vadd.f32 %v188_v15, %v180_v11  ;;  %v201_v19 = vsel %vm197_vm0, %v182_v14, 0.0  ;;  %v181_v22 = vld [vmem:[%s173_s8 + $0x30] sm:$0xf]  ;;  %v187_v23 = vld [vmem:[%s173_s8 + $0x60] sm:$0xff] }
  0x24   : > { %v202_v20 = vsel %vm197_vm0, %v190_v16, 0.0  ;;  %v425_v24 = vpack.c.bf16 %v193_v13, %v191_v12  ;;  %v189_v26 = vld [vmem:[%s173_s8 + $0x70] sm:$0xf]  ;;  %v195_v27 = vadd.f32 %v187_v23, %v179_v21  ;;  %v198_v28 = vsel %vm197_vm0, %v181_v22, 0.0  ;;  %s514_s8 = scalar_lea.vmem %s721_s4, 512 }
  0x25   : > { %v203_v25 = vadd.f32 %v202_v20, %v201_v19  ;;  %424 = vmatprep.subr.bf16.mxu0 %v423_v17  ;;  %433 = vmatprep.subr.bf16.mxu1 %v423_v17  ;;  %v199_v29 = vsel %vm197_vm0, %v189_v26, 0.0  ;;  %p515_p0 = scmp.ne.s32.totalorder %s721_s4, %s514_s8  ;;  %p522_p5 = scmp.lt.s32.totalorder %s520_s21, %s514_s8 }
  0x26   : > { %426 = vmatpush1.bf16.msra.mxu0 %v425_v24  ;;  %435 = vmatpush1.bf16.msra.mxu1 %v425_v24  ;;  %v200_v31 = vadd.f32 %v199_v29, %v198_v28 }
  0x27   : > { %v427_v30 = vpack.c.bf16 %v203_v25, %v196_v18  ;;  %p516_p1 = pnand %p515_p0, %p681_p3  ;;  %p523_p6 = por %p522_p5, %p521_p4 }
  0x28   : > { %v430_v32 = vpack.c.bf16 %v200_v31, %v195_v27 }
  0x29   : > { %429 = vmatprep.subr.msk.bf16.mxu0 %vm428_vm2, %v427_v30  ;;  %434 = vmatprep.subr.msk.bf16.mxu1 %vm428_vm2, %v427_v30  ;;  %p517_p2 = pneg %p516_p1 }
  0x2a   : > { %432 = vmatpush1.bf16.msk.msra.mxu0 %vm428_vm2, %v430_v32  ;;  %436 = vmatpush1.bf16.msk.msra.mxu1 %vm428_vm2, %v430_v32 }
  0x2b   : > { %p524_p7 = pnand %p523_p6, %p517_p2 }
  0x2d   : > { %416 = vmatmul.mubr.msk.f32.vlgmr.msra.gmra.mrb[0].mxu0 %vm206_vm3, %v204_v33  ;;  %417 = vmatmul.mubr.msk.f32.vlgmr.msra.gmra.mrb[0].mxu1 %vm206_vm3, %v205_v34 }
 0x100   : > { %v285_v35 = vpop.f32.mrb[0].mxu0  ;;  %v291_v36 = vpop.f32.mrb[0].mxu1 }
 0x101   : > { %v296_v37 = vmul.f32 0.25, %v285_v35  ;;  %v298_v38 = vmul.f32 0.25, %v291_v36  ;;  %v287_v39 = vpop.f32.mrb[1].mxu0  ;;  %v293_v40 = vpop.f32.mrb[1].mxu1 }
 0x102   : > { %v297_v41 = vmul.f32 0.25, %v287_v39  ;;  %v299_v42 = vmul.f32 0.25, %v293_v40 }
 0x103   : > { %300 = vst [vmem:[%s163_s3] sm:$0xff] %v296_v37  ;;  %302 = vst [vmem:[%s163_s3 + $0x10] sm:$0x3f] %v298_v38 }
 0x104   : > { %301 = vst [vmem:[%s163_s3 + $0x8] sm:$0xff] %v297_v41  ;;  %303 = vst [vmem:[%s163_s3 + $0x18] sm:$0x3f] %v299_v42 }
 0x105   : > { %527 = shalt.err (!%p524_p7)
}
 0x106   : > { %s528_s24 = scalar_lea.hbm %s726_s13, 512  ;;  %s532_s28 = scalar_lea.hbm %s782_s2, 229376 }
 0x107   : > { %p529_p9 = scmp.ne.s32.totalorder %s726_s13, %s528_s24  ;;  %p533_p12 = scmp.lt.u32.totalorder %s726_s13, %s782_s2 }
 0x108   : > { %p534_p13 = scmp.lt.u32.totalorder %s532_s28, %s528_s24  ;;  %p536_p1 = scmp.lt.u32.totalorder %s528_s24, %s726_s13 }
 0x109   : > { %p530_p10 = pnand %p529_p9, %p681_p3 }
 0x10a   : > { %p535_p0 = por %p534_p13, %p533_p12 }
 0x10b   : > { %p531_p11 = pneg %p530_p10 }
 0x10c   : > { %p537_p2 = por %p536_p1, %p535_p0 }
 0x10e   : > { %p538_p4 = pnand %p537_p2, %p531_p11 }
 0x110   : > { %541 = shalt.err (!%p538_p4)
}
 0x111   : > { %s613_s3 = smov 256   ;;  %s614_s5 = smov 16  }
 0x112   : > { %439 = dma.vmem_to_hbm [thread:$0]  (%p681_p3), %s721_s4, 512, %s726_s13, %s728_s12, %s613_s3, %s613_s3, %s614_s5  }
 0x113 PF: > { %p445_p5 = scmp.ge.s32.totalorder %s608_s16, 2  ;;  %s335_s6 = sand.u32 1, %s580_s9  }
 0x114   : > { %s336_s7 = scalar_lea.sflag [#allocation3], %s335_s6 }
 0x115   : > { %p442_p6 = pnand %p445_p5, %p690_p8 }
 0x117   : > { %575 = dma.done.wait (!%p442_p6), %s336_s7, 512  }
 0x118   : > { %577 = vsyncadd (!%p442_p6), %s336_s7, 4294966784  ;;  %s15_s16 = sadd.s32 1, %s608_s16   ;;  %s785_s9 = smov %s584_s10 }
 0x119   : > { %p12_p7 = scmp.ge.s32.totalorder %s15_s16, 450   ;;  %s786_s10 = smov %s588_s11 }
 0x11a   : > { %s787_s11 = smov %s699_s27  ;;  %s788_s12 = smov %s600_s14 }
 0x11b   : > { %s789_s13 = smov %s604_s15  ;;  %s790_s14 = smov %s793_s19 }
 0x11c   : > { %s791_s15 = smov %s797_s20  ;;  %14 = sbr.rel (!%p12_p7) target bundleno = 5 (0x5), region = 63 }
 0x123   :  { %341 = vsyncpa [#allocation3], 1 }
 0x124   :  { %343 = vsyncpa [#allocation3 + $0x1], 1 }

</bundles_post_ra>
